<compile_context>
chip_gen: v7x
topology: tpu7x:2x2x1
jax: 0.10.0
libtpu: 0.0.40
codegen_flags: <defaults>
</compile_context>

<pallas_src>
import math

import jax
import jax.numpy as jnp
from jax.experimental import pallas as pl
from jax.experimental.pallas import tpu as pltpu

_LANES = 128
_SUBLANES = 8
# (4096, 128) f32 = 2 MiB per input per block; 2 inputs x 2 pipeline buffers
# = 8 MiB, comfortably under the scoped-VMEM defaults on v5e/v6e/v7x.
_MAX_BLOCK_ROWS = 4096


def _make_mse_sum_kernel(block_rows, total_rows, needs_mask, single_block):
    """Build a kernel computing sum((x - y)^2) over a (rows, 128) slab."""

    def kernel(x_ref, y_ref, out_ref, acc_ref):
        # Cast in-kernel (VPU) so HBM only moves the native-dtype bytes.
        d = x_ref[...].astype(jnp.float32) - y_ref[...].astype(jnp.float32)
        sq = d * d

        if needs_mask:
            # Zero out rows past the end of the array (last partial block).
            row = (pl.program_id(0) * block_rows
                   + jax.lax.broadcasted_iota(jnp.int32, sq.shape, 0))
            sq = jnp.where(row < total_rows, sq, jnp.float32(0.0))

        if single_block:
            # One grid step: a single full reduce is fine.
            out_ref[0, 0] = jnp.sum(sq)
        else:
            @pl.when(pl.program_id(0) == 0)
            def _init():
                acc_ref[...] = jnp.zeros_like(acc_ref)

            # VPU-only accumulation into an (8, 128) vector accumulator; the
            # (groups, 8, 128) view matches the native sublane layout, and the
            # axis-0 reduce is a stack of elementwise vreg adds (no XLU).
            acc_ref[...] += jnp.sum(
                sq.reshape(block_rows // _SUBLANES, _SUBLANES, _LANES), axis=0)

            @pl.when(pl.program_id(0) == pl.num_programs(0) - 1)
            def _fin():
                # Single cross-lane reduce for the whole tensor pair.
                out_ref[0, 0] = jnp.sum(acc_ref[...])

    return kernel


def _mse_mean_impl(x, y):
    """mean((x - y)^2) over all elements, computed with a Pallas TPU kernel."""
    assert x.shape == y.shape, (x.shape, y.shape)
    n = math.prod(x.shape)

    xf = x.reshape(-1)
    yf = y.reshape(-1)

    # Lane alignment: pad only a (<128-element) tail, and only when needed.
    # For typical NCHW activations n % 128 == 0, so this is a no-op (no copy).
    # Padded lanes contribute (0 - 0)^2 = 0, so the sum stays exact.
    # TODO(synk): replace the tail pad with in-kernel element masking to avoid
    # the copy for lane-misaligned inputs.
    rem = n % _LANES
    if rem:
        pad = _LANES - rem
        xf = jnp.pad(xf, (0, pad))
        yf = jnp.pad(yf, (0, pad))

    rows = xf.shape[0] // _LANES
    x2 = xf.reshape(rows, _LANES)
    y2 = yf.reshape(rows, _LANES)

    if rows <= _MAX_BLOCK_ROWS:
        block_rows = rows          # block == full array dims: always legal
        grid = 1
        single_block = True
        needs_mask = False
    else:
        block_rows = _MAX_BLOCK_ROWS    # multiple of 8 -> legal block shape
        grid = pl.cdiv(rows, block_rows)
        single_block = False
        needs_mask = (rows % block_rows) != 0

    kernel = _make_mse_sum_kernel(block_rows, rows, needs_mask, single_block)

    sq_sum = pl.pallas_call(
        kernel,
        out_shape=jax.ShapeDtypeStruct((1, 1), jnp.float32),
        grid_spec=pltpu.PrefetchScalarGridSpec(
            num_scalar_prefetch=0,
            grid=(grid,),
            in_specs=[
                pl.BlockSpec((block_rows, _LANES), lambda i: (i, 0)),
                pl.BlockSpec((block_rows, _LANES), lambda i: (i, 0)),
            ],
            out_specs=pl.BlockSpec(
                (1, 1), lambda i: (0, 0), memory_space=pltpu.SMEM),
            scratch_shapes=[pltpu.VMEM((_SUBLANES, _LANES), jnp.float32)],
        ),
        compiler_params=pltpu.CompilerParams(
            dimension_semantics=("arbitrary",),   # reduction axis
        ),
        # TODO(synk): on v7x, add a leading "parallel" grid axis of size 2
        # (one partial sum per TensorCore) for ~2x on megacore chips.
    )(x2, y2)

    return sq_sum[0, 0] / jnp.float32(n)


# jit so the reshape/pad glue and the kernel dispatch compile to one cached
# executable per input shape/dtype (amortizes launch/dispatch overhead).
_mse_mean_pallas = jax.jit(_mse_mean_impl)


def multiple_mse_loss(x, y):
    """Pallas-backed equivalent of MultipleMSELoss(reduction='mean').forward.

    x: list of arrays.  y: list of arrays or tuples (yt, wt) / (yt, wt, 'mse').
    Returns (loss_sum, multi_loss).
    """
    # TODO(synk): reduction='none' (elementwise output) not wired up; the
    # module default ('mean') is what is implemented here.
    # TODO(synk): fuse all (xt, yt) pairs into one pallas_call (segment
    # offsets via scalar prefetch) to amortize launches for many tiny pairs.
    loss_sum = jnp.float32(0.0)
    multi_loss = []
    for xt, yt in zip(x, y):
        if isinstance(yt, tuple):
            if len(yt) == 2:
                yt, wt = yt
                lt = "mse"
            elif len(yt) == 3:
                yt, wt, lt = yt
            else:
                raise NotImplementedError
        else:
            wt, lt = 1.0, "mse"
        if lt == "mse":
            loss = _mse_mean_pallas(xt, yt)
        else:
            raise NotImplementedError
        loss_sum = loss_sum + loss * wt
        multi_loss.append(loss)
    return loss_sum, multi_loss


if __name__ == "__main__":
    key = jax.random.PRNGKey(0)
    k0, k1, k2, k3, k4, k5 = jax.random.split(key, 6)

    # Small NCHW prediction/target pairs (as the slowfast module sees them)...
    x0 = jax.random.normal(k0, (2, 4, 16, 16), dtype=jnp.float32)
    y0 = jax.random.normal(k1, (2, 4, 16, 16), dtype=jnp.float32)
    x1 = jax.random.normal(k2, (2, 4, 8, 8), dtype=jnp.float32)
    y1 = jax.random.normal(k3, (2, 4, 8, 8), dtype=jnp.float32)
    # ...plus one pair large enough to exercise the multi-block grid, the
    # in-kernel row mask and the lane-tail pad (2*3*300*300 = 540000 elems).
    x2 = jax.random.normal(k4, (2, 3, 300, 300), dtype=jnp.float32)
    y2 = jax.random.normal(k5, (2, 3, 300, 300), dtype=jnp.float32)

    x = [x0, x1, x2]
    # First target carries an explicit weight, second defaults to 1.0, third
    # uses the 3-tuple (target, weight, loss-type) form.
    y = [(y0, 0.5), y1, (y2, 2.0, "mse")]

    loss_sum, multi_loss = multiple_mse_loss(x, y)
    loss_sum = jax.block_until_ready(loss_sum)
    multi_loss = [jax.block_until_ready(l) for l in multi_loss]

    # Pure-JAX reference check.
    ref0 = jnp.mean((x0 - y0) ** 2)
    ref1 = jnp.mean((x1 - y1) ** 2)
    ref2 = jnp.mean((x2 - y2) ** 2)
    ref_sum = ref0 * 0.5 + ref1 * 1.0 + ref2 * 2.0
    assert jnp.allclose(multi_loss[0], ref0, rtol=1e-4, atol=1e-6)
    assert jnp.allclose(multi_loss[1], ref1, rtol=1e-4, atol=1e-6)
    assert jnp.allclose(multi_loss[2], ref2, rtol=1e-4, atol=1e-6)
    assert jnp.allclose(loss_sum, ref_sum, rtol=1e-4, atol=1e-6)

    print("KERNEL_OK")
</pallas_src>

<mosaic_0001>
module attributes {stable_mosaic.version = 11 : i64} {
  func.func @kernel(%arg0: i32, %arg1: memref<16x128xf32, #tpu.memory_space<vmem>>, %arg2: memref<16x128xf32, #tpu.memory_space<vmem>>, %arg3: memref<1x1xf32, #tpu.memory_space<smem>>, %arg4: memref<8x128xf32, #tpu.memory_space<vmem>>) attributes {dimension_semantics = [#tpu.dimension_semantics<arbitrary>], iteration_bounds = array<i64: 1>, scalar_prefetch = 0 : i64, scratch_operands = 1 : i64, tpu.core_type = #tpu.core_type<tc>, window_params = [{transform_indices = @transform_0, window_bounds = array<i64: 16, 128>}, {transform_indices = @transform_1, window_bounds = array<i64: 16, 128>}, {transform_indices = @transform_2, window_bounds = array<i64: 1, 1>}]} {
    %c0 = arith.constant 0 : index
    %c0_0 = arith.constant 0 : index
    %0 = vector.load %arg1[%c0, %c0_0] : memref<16x128xf32, #tpu.memory_space<vmem>>, vector<16x128xf32>
    %c0_1 = arith.constant 0 : index
    %c0_2 = arith.constant 0 : index
    %1 = vector.load %arg2[%c0_1, %c0_2] : memref<16x128xf32, #tpu.memory_space<vmem>>, vector<16x128xf32>
    %2 = arith.subf %0, %1 : vector<16x128xf32>
    %3 = arith.mulf %2, %2 : vector<16x128xf32>
    %4 = vector.shape_cast %3 : vector<16x128xf32> to vector<1x16x128xf32>
    %cst = arith.constant dense<0.000000e+00> : vector<1xf32>
    %5 = vector.multi_reduction <add>, %4, %cst [1, 2] : vector<1x16x128xf32> to vector<1xf32>
    %6 = vector.shape_cast %5 : vector<1xf32> to vector<1x1x1xf32>
    %7 = vector.extract %6[0, 0, 0] : f32 from vector<1x1x1xf32>
    %c0_3 = arith.constant 0 : index
    %c0_4 = arith.constant 0 : index
    %8 = memref.load %arg3[%c0_3, %c0_4] : memref<1x1xf32, #tpu.memory_space<smem>>
    memref.store %7, %arg3[%c0_3, %c0_4] : memref<1x1xf32, #tpu.memory_space<smem>>
    return
  }
  func.func @transform_0(%arg0: i32) -> (i32, i32) {
    %c0_i32 = arith.constant 0 : i32
    %c0_i32_0 = arith.constant 0 : i32
    return %arg0, %c0_i32 : i32, i32
  }
  func.func @transform_1(%arg0: i32) -> (i32, i32) {
    %c0_i32 = arith.constant 0 : i32
    %c0_i32_0 = arith.constant 0 : i32
    return %arg0, %c0_i32 : i32, i32
  }
  func.func @transform_2(%arg0: i32) -> (i32, i32) {
    %c0_i32 = arith.constant 0 : i32
    %c0_i32_0 = arith.constant 0 : i32
    %c0_i32_1 = arith.constant 0 : i32
    return %c0_i32, %c0_i32_0 : i32, i32
  }
}

</mosaic_0001>

<bundles_post_ra>
// kernel: _mse_mean_impl.1
= control target key start
LH: loop header
LB: loop body
LE: loop exit
PB: predicated region body
PF: predicated region fallthrough
CT: control target
= control target key end

     0   :  { %s100_s0 = inlined_call_operand.vmem [shape: f32[16,128], index: 0, kind: input, shape index: {}]   ;;  %s101_s1 = inlined_call_operand.vmem [shape: f32[16,128], index: 1, kind: input, shape index: {}]   ;;  %s102_s2 = inlined_call_operand.hbm [shape: f32[1,1], index: 2, kind: output, shape index: {}]  }
   0x1   :  { %v12_v0 = vld [vmem:[%s100_s0] sm:$0xff]  ;;  %v13_v1 = vld [vmem:[%s100_s0 + $0x8] sm:$0xff] }
   0x2   :  { %v14_v2 = vld [vmem:[%s101_s1] sm:$0xff]  ;;  %v15_v3 = vld [vmem:[%s101_s1 + $0x8] sm:$0xff] }
   0x3   :  { %v16_v4 = vsub.f32 %v12_v0, %v14_v2 }
   0x4   :  { %7 = vsyncpa [#allocation4], 0  ;;  %v17_v5 = vsub.f32 %v13_v1, %v15_v3  ;;  %s48_s1 = scalar_lea.hbm %s102_s2, 16 }
   0x5   :  { %v18_v6 = vmul.f32 %v16_v4, %v16_v4  ;;  %p49_p0 = scmp.ne.s32.totalorder %s102_s2, %s48_s1  ;;  %p52_p1 = scmp.lt.u32.totalorder %s48_s1, %s102_s2 }
   0x6   :  { %v19_v7 = vmul.f32 %v17_v5, %v17_v5 }
   0x7   :  { %p54_p2 = pnand %p52_p1, %p49_p0 }
   0x8   :  { %v20_v8 = vadd.f32 %v19_v7, %v18_v6 }
   0xa   :  { %21 = vadd.xlane.f32.xlu0 %v20_v8 }
  0x97   :  { %v22_v9 = vpop.xlane.xlu0 %21 }
  0x98   :  { %v23_v10 = vrot.slane %v22_v9, 4 }
  0x9a   :  { %v24_v11 = vadd.f32 %v23_v10, %v22_v9 }
  0x9c   :  { %v25_v12 = vrot.slane %v24_v11, 2 }
  0x9e   :  { %v26_v13 = vadd.f32 %v25_v12, %v24_v11 }
  0xa0   :  { %v27_v14 = vrot.slane %v26_v13, 1 }
  0xa2   :  { %v28_v15 = vadd.f32 %v27_v14, %v26_v13 }
  0xa4   :  { %45 = vpush %v28_v15 }
  0xd5   :  { %s46_s0 = spop %45 }
  0xd6   :  { %31 = sst [smem:[#allocation3]] %s46_s0 }
  0xd7   :  { %57 = shalt.err (!%p54_p2)
}
  0xd8   :  { %s60_s23 = smov [#allocation3]  }
  0xd9   :  { %39 = dma.smem_to_hbm %s60_s23, 16, %s102_s2, [#allocation4]  }
  0xda   :  { %58 = dma.done.wait [#allocation4], 16  }
  0xdb   :  { %59 = vsyncadd [#allocation4], 4294967280 }
  0xdc   :  { %43 = sfence }
  0xdd   :  { %44 = vsyncpa [#allocation4], 1 }

</bundles_post_ra>
